<compile_context>
chip_gen: v7x
topology: tpu7x:2x2x1
jax: 0.10.0
libtpu: 0.0.40
codegen_flags: <defaults>
</compile_context>

<pallas_src>
import jax
import jax.numpy as jnp
from jax.experimental import pallas as pl
from jax.experimental.pallas import tpu as pltpu

IGNORE_INDEX = -100

_TILE_BUDGET_BYTES = 12 * 1024 * 1024   # one pipeline buffer of (tm, V) logits
_VMEM_LIMIT_BYTES = 40 * 1024 * 1024    # safe on v5e/v6e (128 MiB) and v7x (64 MiB)


def _round_up(x, m):
    return (x + m - 1) // m * m


def _pick_tm(T: int, V: int, itemsize: int) -> int:
    """Largest row-tile (multiple of 8, <= T) that fits the VMEM budget."""
    rows = T - 1
    if T < 8:
        return T  # one full-extent block along T (satisfies layout constraints)
    # VMEM bytes per row: logits row + labels row (lane-padded to 128 x i32)
    bytes_per_row = V * itemsize + 128 * 4
    tm = _TILE_BUDGET_BYTES // bytes_per_row
    tm = min(tm, 4096, _round_up(rows, 8), (T // 8) * 8)
    return max(8, (tm // 8) * 8)


def _ce_partial_kernel(logits_ref, labels_ref, out_ref):
    """One (tm, V) row-tile: per-row CE reduced to a partial (sum, count)."""
    x = logits_ref[...].astype(jnp.float32)          # (tm, V)
    lbl = labels_ref[...]                            # (tm, 1) int32
    valid = lbl != IGNORE_INDEX                      # (tm, 1) bool

    # Zero out ignored / padded / out-of-bounds rows so garbage HBM data can
    # never produce inf/NaN inside the block (they are masked from the sum).
    x = jnp.where(valid, x, 0.0)

    # Numerically stable log-sum-exp per row.
    m = jnp.max(x, axis=-1, keepdims=True)                              # (tm, 1)
    lse = jnp.log(jnp.sum(jnp.exp(x - m), axis=-1, keepdims=True)) + m  # (tm, 1)

    # Target logit via one-hot compare (no dynamic lane gather on TPU).
    col = jax.lax.broadcasted_iota(jnp.int32, x.shape, 1)               # (tm, V)
    tgt = jnp.sum(jnp.where(col == lbl, x, 0.0), axis=-1, keepdims=True)

    loss = jnp.where(valid, lse - tgt, 0.0)                             # (tm, 1)
    psum = jnp.sum(loss)
    pcnt = jnp.sum(valid.astype(jnp.float32))

    # Lane-dense partial tile: [0, 0] = loss sum, [0, 1] = valid count.
    r = jax.lax.broadcasted_iota(jnp.int32, (8, 128), 0)
    c = jax.lax.broadcasted_iota(jnp.int32, (8, 128), 1)
    tile = jnp.where((r == 0) & (c == 0), psum, 0.0)
    tile = jnp.where((r == 0) & (c == 1), pcnt, tile)
    out_ref[...] = tile


@jax.jit
def gpt_lm_loss(logits, labels):
    """Equivalent of GPTLMLoss.forward: mean CE over shifted (logits, labels)."""
    B, T, V = logits.shape
    rows = T - 1                                   # rows that carry a loss term
    itemsize = jnp.dtype(logits.dtype).itemsize
    tm = _pick_tm(T, V, itemsize)
    t_blocks = pl.cdiv(rows, tm)
    rows_pad = t_blocks * tm

    # Only the tiny labels tensor is shifted / padded on the host side.
    # shift_labels[b, r] = labels[b, r+1] pairs with logits[b, r, :]; rows
    # >= T-1 (incl. the dropped last logits row and any tile tail) get IGNORE.
    shift_labels = labels[:, 1:].astype(jnp.int32)
    shift_labels = jnp.pad(shift_labels, ((0, 0), (0, rows_pad - rows)),
                           constant_values=IGNORE_INDEX)
    shift_labels = shift_labels.reshape(B, rows_pad, 1)

    partials = pl.pallas_call(
        _ce_partial_kernel,
        out_shape=jax.ShapeDtypeStruct((B, t_blocks, 8, 128), jnp.float32),
        grid_spec=pltpu.PrefetchScalarGridSpec(
            num_scalar_prefetch=0,
            grid=(B, t_blocks),
            in_specs=[
                # Original logits, no shift copy: tail block past T is
                # garbage-padded by Pallas and masked in-kernel via labels.
                pl.BlockSpec((None, tm, V), lambda b, t: (b, t, 0)),
                pl.BlockSpec((None, tm, 1), lambda b, t: (b, t, 0)),
            ],
            out_specs=pl.BlockSpec((None, None, 8, 128),
                                   lambda b, t: (b, t, 0, 0)),
        ),
        compiler_params=pltpu.CompilerParams(
            dimension_semantics=("parallel", "parallel"),
            vmem_limit_bytes=_VMEM_LIMIT_BYTES,
        ),
    )(logits, shift_labels)

    loss_sum = jnp.sum(partials[:, :, 0, 0])
    valid_cnt = jnp.sum(partials[:, :, 0, 1])
    # NaN if every token is ignored (0/0) — same as nn.CrossEntropyLoss mean.
    return loss_sum / valid_cnt


def _reference_loss(logits, labels):
    V = logits.shape[-1]
    sl = logits[:, :-1, :].reshape(-1, V).astype(jnp.float32)
    ll = labels[:, 1:].reshape(-1)
    lse = jax.nn.logsumexp(sl, axis=-1)
    tgt = jnp.take_along_axis(sl, jnp.clip(ll, 0, V - 1)[:, None], axis=-1)[:, 0]
    valid = ll != IGNORE_INDEX
    per_tok = jnp.where(valid, lse - tgt, 0.0)
    return jnp.sum(per_tok) / jnp.sum(valid.astype(jnp.float32))


if __name__ == "__main__":
    key = jax.random.PRNGKey(0)
    k1, k2, k3, k4 = jax.random.split(key, 4)

    # Test 1: small GPT-like shapes, f32 logits, with an ignored label.
    B, T, V = 2, 9, 128
    logits = jax.random.normal(k1, (B, T, V), dtype=jnp.float32)
    labels = jax.random.randint(k2, (B, T), 0, V, dtype=jnp.int32)
    labels = labels.at[0, 3].set(IGNORE_INDEX)
    loss = gpt_lm_loss(logits, labels)
    jax.block_until_ready(loss)
    ref = _reference_loss(logits, labels)
    assert jnp.allclose(loss, ref, rtol=1e-5, atol=1e-5), (loss, ref)

    # Test 2: bf16 logits, T-1 not a multiple of the row tile (exercises the
    # in-kernel masking of the partially out-of-bounds tail block).
    B2, T2, V2 = 2, 14, 128
    logits2 = jax.random.normal(k3, (B2, T2, V2), dtype=jnp.float32)
    logits2 = logits2.astype(jnp.bfloat16)
    labels2 = jax.random.randint(k4, (B2, T2), 0, V2, dtype=jnp.int32)
    loss2 = gpt_lm_loss(logits2, labels2)
    jax.block_until_ready(loss2)
    ref2 = _reference_loss(logits2.astype(jnp.float32), labels2)
    assert jnp.allclose(loss2, ref2, rtol=1e-4, atol=1e-4), (loss2, ref2)

    print("KERNEL_OK")
</pallas_src>

<mosaic_0001>
module attributes {stable_mosaic.version = 11 : i64} {
  func.func @_ce_partial_kernel(%arg0: i32, %arg1: i32, %arg2: memref<1x8x128xf32, #tpu.memory_space<vmem>>, %arg3: memref<1x8x1xi32, #tpu.memory_space<vmem>>, %arg4: memref<1x1x8x128xf32, #tpu.memory_space<vmem>>) attributes {dimension_semantics = [#tpu.dimension_semantics<parallel>, #tpu.dimension_semantics<parallel>], iteration_bounds = array<i64: 2, 1>, scalar_prefetch = 0 : i64, scratch_operands = 0 : i64, tpu.core_type = #tpu.core_type<tc>, window_params = [{transform_indices = @transform_0, window_bounds = array<i64: 1, 8, 128>}, {transform_indices = @transform_1, window_bounds = array<i64: 1, 8, 1>}, {transform_indices = @transform_2, window_bounds = array<i64: 1, 1, 8, 128>}]} {
    %c0 = arith.constant 0 : index
    %c0_0 = arith.constant 0 : index
    %c0_1 = arith.constant 0 : index
    %0 = vector.load %arg2[%c0, %c0_0, %c0_1] : memref<1x8x128xf32, #tpu.memory_space<vmem>>, vector<1x8x128xf32>
    %1 = vector.shape_cast %0 : vector<1x8x128xf32> to vector<8x128xf32>
    %c0_2 = arith.constant 0 : index
    %c0_3 = arith.constant 0 : index
    %c0_4 = arith.constant 0 : index
    %2 = vector.load %arg3[%c0_2, %c0_3, %c0_4] : memref<1x8x1xi32, #tpu.memory_space<vmem>>, vector<1x8x1xi32>
    %3 = vector.shape_cast %2 : vector<1x8x1xi32> to vector<8x1xi32>
    %c-100_i32 = arith.constant -100 : i32
    %4 = vector.broadcast %c-100_i32 : i32 to vector<8x1xi32>
    %5 = arith.cmpi ne, %3, %4 : vector<8x1xi32>
    %cst = arith.constant 0.000000e+00 : f32
    %6 = vector.shape_cast %5 : vector<8x1xi1> to vector<8x1xi1>
    %7 = vector.broadcast %6 : vector<8x1xi1> to vector<8x128xi1>
    %8 = vector.broadcast %cst : f32 to vector<8x128xf32>
    %9 = arith.select %7, %1, %8 : vector<8x128xi1>, vector<8x128xf32>
    %cst_5 = arith.constant dense<0xFF800000> : vector<8xf32>
    %10 = vector.multi_reduction <maximumf>, %9, %cst_5 [1] : vector<8x128xf32> to vector<8xf32>
    %11 = vector.shape_cast %10 : vector<8xf32> to vector<8x1xf32>
    %12 = vector.broadcast %11 : vector<8x1xf32> to vector<8x128xf32>
    %13 = arith.subf %9, %12 : vector<8x128xf32>
    %14 = math.exp %13 : vector<8x128xf32>
    %cst_6 = arith.constant dense<0.000000e+00> : vector<8xf32>
    %15 = vector.multi_reduction <add>, %14, %cst_6 [1] : vector<8x128xf32> to vector<8xf32>
    %16 = vector.shape_cast %15 : vector<8xf32> to vector<8x1xf32>
    %17 = math.log %16 : vector<8x1xf32>
    %18 = arith.addf %17, %11 : vector<8x1xf32>
    %19 = tpu.iota {dimensions = array<i32: 1>} : vector<8x128xi32>
    %20 = vector.broadcast %3 : vector<8x1xi32> to vector<8x128xi32>
    %21 = arith.cmpi eq, %19, %20 : vector<8x128xi32>
    %cst_7 = arith.constant 0.000000e+00 : f32
    %22 = vector.broadcast %cst_7 : f32 to vector<8x128xf32>
    %23 = arith.select %21, %9, %22 : vector<8x128xi1>, vector<8x128xf32>
    %cst_8 = arith.constant dense<0.000000e+00> : vector<8xf32>
    %24 = vector.multi_reduction <add>, %23, %cst_8 [1] : vector<8x128xf32> to vector<8xf32>
    %25 = vector.shape_cast %24 : vector<8xf32> to vector<8x1xf32>
    %26 = arith.subf %18, %25 : vector<8x1xf32>
    %cst_9 = arith.constant 0.000000e+00 : f32
    %27 = vector.broadcast %cst_9 : f32 to vector<8x1xf32>
    %28 = arith.select %5, %26, %27 : vector<8x1xi1>, vector<8x1xf32>
    %29 = vector.shape_cast %28 : vector<8x1xf32> to vector<1x8x1xf32>
    %cst_10 = arith.constant dense<0.000000e+00> : vector<1xf32>
    %30 = vector.multi_reduction <add>, %29, %cst_10 [1, 2] : vector<1x8x1xf32> to vector<1xf32>
    %31 = vector.shape_cast %30 : vector<1xf32> to vector<1x1x1xf32>
    %32 = vector.extract %31[0, 0, 0] : f32 from vector<1x1x1xf32>
    %33 = arith.extui %5 : vector<8x1xi1> to vector<8x1xi32>
    %34 = arith.sitofp %33 : vector<8x1xi32> to vector<8x1xf32>
    %35 = vector.shape_cast %34 : vector<8x1xf32> to vector<1x8x1xf32>
    %cst_11 = arith.constant dense<0.000000e+00> : vector<1xf32>
    %36 = vector.multi_reduction <add>, %35, %cst_11 [1, 2] : vector<1x8x1xf32> to vector<1xf32>
    %37 = vector.shape_cast %36 : vector<1xf32> to vector<1x1x1xf32>
    %38 = vector.extract %37[0, 0, 0] : f32 from vector<1x1x1xf32>
    %39 = tpu.iota {dimensions = array<i32: 0>} : vector<8x128xi32>
    %40 = tpu.iota {dimensions = array<i32: 1>} : vector<8x128xi32>
    %c0_i32 = arith.constant 0 : i32
    %41 = vector.broadcast %c0_i32 : i32 to vector<8x128xi32>
    %42 = arith.cmpi eq, %39, %41 : vector<8x128xi32>
    %c0_i32_12 = arith.constant 0 : i32
    %43 = vector.broadcast %c0_i32_12 : i32 to vector<8x128xi32>
    %44 = arith.cmpi eq, %40, %43 : vector<8x128xi32>
    %45 = arith.andi %42, %44 : vector<8x128xi1>
    %cst_13 = arith.constant 0.000000e+00 : f32
    %46 = vector.broadcast %32 : f32 to vector<8x128xf32>
    %47 = vector.broadcast %cst_13 : f32 to vector<8x128xf32>
    %48 = arith.select %45, %46, %47 : vector<8x128xi1>, vector<8x128xf32>
    %c0_i32_14 = arith.constant 0 : i32
    %49 = vector.broadcast %c0_i32_14 : i32 to vector<8x128xi32>
    %50 = arith.cmpi eq, %39, %49 : vector<8x128xi32>
    %c1_i32 = arith.constant 1 : i32
    %51 = vector.broadcast %c1_i32 : i32 to vector<8x128xi32>
    %52 = arith.cmpi eq, %40, %51 : vector<8x128xi32>
    %53 = arith.andi %50, %52 : vector<8x128xi1>
    %54 = vector.broadcast %38 : f32 to vector<8x128xf32>
    %55 = arith.select %53, %54, %48 : vector<8x128xi1>, vector<8x128xf32>
    %c0_15 = arith.constant 0 : index
    %c0_16 = arith.constant 0 : index
    %c0_17 = arith.constant 0 : index
    %c0_18 = arith.constant 0 : index
    %56 = vector.load %arg4[%c0_15, %c0_16, %c0_17, %c0_18] : memref<1x1x8x128xf32, #tpu.memory_space<vmem>>, vector<1x1x8x128xf32>
    %57 = vector.shape_cast %56 : vector<1x1x8x128xf32> to vector<8x128xf32>
    %58 = vector.shape_cast %55 : vector<8x128xf32> to vector<1x1x8x128xf32>
    tpu.vector_store %arg4[%c0_15, %c0_16, %c0_17, %c0_18], %58 {strides = array<i32>} : memref<1x1x8x128xf32, #tpu.memory_space<vmem>>, vector<1x1x8x128xf32>,
    return
  }
  func.func @transform_0(%arg0: i32, %arg1: i32) -> (i32, i32, i32) {
    %c0_i32 = arith.constant 0 : i32
    %c0_i32_0 = arith.constant 0 : i32
    return %arg0, %arg1, %c0_i32 : i32, i32, i32
  }
  func.func @transform_1(%arg0: i32, %arg1: i32) -> (i32, i32, i32) {
    %c0_i32 = arith.constant 0 : i32
    %c0_i32_0 = arith.constant 0 : i32
    return %arg0, %arg1, %c0_i32 : i32, i32, i32
  }
  func.func @transform_2(%arg0: i32, %arg1: i32) -> (i32, i32, i32, i32) {
    %c0_i32 = arith.constant 0 : i32
    %c0_i32_0 = arith.constant 0 : i32
    %c0_i32_1 = arith.constant 0 : i32
    return %arg0, %arg1, %c0_i32, %c0_i32_0 : i32, i32, i32, i32
  }
}

</mosaic_0001>

<bundles_post_ra>
// kernel: gpt_lm_loss.1
= control target key start
LH: loop header
LB: loop body
LE: loop exit
PB: predicated region body
PF: predicated region fallthrough
CT: control target
= control target key end

     0   :  { %s447_s9 = smov 0   ;;  %s449_s10 = smov 0   ;;  %s494_s0 = inlined_call_operand.vmem [shape: f32[2,9,128], index: 0, kind: input, shape index: {}]   ;;  %s495_s1 = inlined_call_operand.vmem [shape: s32[2,8,1], index: 1, kind: input, shape index: {}]   ;;  %s496_s2 = inlined_call_operand.vmem [shape: f32[2,1,8,128], index: 2, kind: output, shape index: {}]  }
   0x1   :  { %s451_s11 = smov 0  }
   0x2 LB: > { %s24_s12 = sadd.s32 1, %s424_s10  ;;  %p361_p0 = scmp.ge.s32.totalorder %s428_s11, 1  ;;  %s428_s11 = sphi %s451_s11, %s12_s11   ;;  %s424_s10 = sphi %s449_s10, %s498_s10   ;;  %s420_s9 = sphi %s447_s9, %s497_s9  }
   0x3   : > { %p26_p1 = scmp.ge.s32.totalorder %s24_s12, 2  ;;  %p145_p2 = scmp.lt.s32.totalorder %s428_s11, 3 }
   0x5   : > { %s500_s12 = smov (%p26_p1, %s24_s12), 0  ;;  %p146_p3 = pnand %p361_p0, %p145_p2 }
   0x6   : > { %p179_p4 = scmp.lt.s32.totalorder (!%p146_p3), %s420_s9, 1  ;;  %v430_v0 = vmov (!%p146_p3), 0   ;;  %v220_v3 = vlaneseq (!%p146_p3)  ;;  %vm231_vm3 = vcmask (!%p146_p3), 7168   ;;  %v431_v14 = vmov (!%p146_p3), 0.0  }
   0x7   : > { %149 = sbr.rel (%p146_p3) target bundleno = 676 (0x2a4), region = 28  ;;  %400 = vset.pattern.permute.xlu0 (!%p146_p3), %v430_v0  ;;  %401 = vset.pattern.permute.xlu1 (!%p146_p3), %v430_v0 }
   0x8   : > { %v221_v5 = vand.u32 (!%p146_p3), 127, %v220_v3  ;;  %v254_v39 = vshrl.u32 (!%p146_p3), %v220_v3, 7 }
   0xa   : > { %vm255_vm4 = vcmp.eq.s32.totalorder (!%p146_p3), %v254_v39, 0  ;;  %vm256_vm5 = vcmp.eq.s32.totalorder (!%p146_p3), %v221_v5, 0  ;;  %vm260_vm6 = vcmp.eq.s32.totalorder (!%p146_p3), %v221_v5, 1 }
   0xb   : > { %vm257_vm7 = vmand (!%p146_p3), %vm255_vm4, %vm256_vm5 }
   0xc   : > { %vm261_vm8 = vmand (!%p146_p3), %vm255_vm4, %vm260_vm6 }
   0xe   : > { %s502_s9 = smov (!%p179_p4, %s420_s9), 1 }
   0xf   : > { %s364_s13 = sshll.u32 %s502_s9, 3  ;;  %s369_s17 = sshll.u32 %s502_s9, 4 }
  0x10   : > { %s193_s16 = scalar_lea.vmem %s495_s1, %s364_s13  ;;  %s186_s20 = scalar_lea.vmem %s494_s0, %s369_s17 }
  0x11   : > { %v202_v1 = vld [vmem:[%s193_s16] sm:$0xff]  ;;  %s200_s24 = scalar_lea.vmem %s496_s2, %s364_s13 }
  0x12   : > { %vm203_vm0 = vcmp.ne.s32.totalorder %v202_v1, 4294967196  ;;  %223 = vperm.xlu1 %401, %v202_v1   ;;  %v201_v4 = vld [vmem:[%s186_s20] sm:$0xff] }
  0x13   : > { %v204_v2 = vsel %vm203_vm0, 1, %v430_v0  ;;  %v366_v15 = vsel %vm203_vm0, 1.0, %v431_v14 }
  0x14   : > { %206 = vperm.xlu0 %400, %v204_v2   ;;  %v243_v16 = vsel %vm231_vm3, %v366_v15, 0.0 }
  0x91   : > { %v224_v7 = vpop.permute.xlu1 %223 }
  0x92   : > { %vm225_vm2 = vcmp.eq.s32.totalorder %v221_v5, %v224_v7 }
  0x93   : > { %v207_v6 = vpop.permute.xlu0 %206 }
  0x94   : > { %vm208_vm1 = vcmp.eq.s32.totalorder %v207_v6, 1 }
  0x95   : > { %v209_v8 = vsel %vm208_vm1, %v201_v4, 0.0 }
  0x96   : > { %210 = vmax.xlane.f32.xlu0 %v209_v8  ;;  %v226_v9 = vsel %vm225_vm2, %v209_v8, 0.0 }
  0x9a   : > { %227 = vadd.xlane.f32.xlu0 %v226_v9 }
 0x123   : > { %v211_v10 = vpop.xlane.xlu0 %210 }
 0x124   : > { %v212_v11 = vsub.f32 %v209_v8, %v211_v10 }
 0x126   : > { %v213_v12 = vmul.f32 1.442695, %v212_v11 }
 0x127   : > { %v228_v21 = vpop.xlane.xlu0 %227 }
 0x128   : > { %402 = vpow2.f32 %v213_v12 }
 0x132   : > { %v403_v13 = vpop.eup %402 }
 0x133   : > { %215 = vadd.xlane.f32.xlu1 %v403_v13 }
 0x137   : > { %244 = vadd.xlane.f32.xlu1 %v243_v16 }
 0x1c0   : > { %v216_v17 = vpop.xlane.xlu1 %215 }
 0x1c1   : > { %404 = vlog2.f32 %v216_v17 }
 0x1c4   : > { %v245_v25 = vpop.xlane.xlu1 %244 }
 0x1c5   : > { %v246_v26 = vrot.slane %v245_v25, 4 }
 0x1c7   : > { %v247_v27 = vadd.f32 %v246_v26, %v245_v25 }
 0x1c9   : > { %v248_v28 = vrot.slane %v247_v27, 2 }
 0x1cb   : > { %v405_v18 = vpop.eup %404  ;;  %v249_v32 = vadd.f32 %v248_v28, %v247_v27 }
 0x1cc   : > { %v218_v19 = vmul.f32 0.6931472, %v405_v18 }
 0x1cd   : > { %v250_v35 = vrot.slane %v249_v32, 1 }
 0x1ce   : > { %v219_v20 = vadd.f32 %v218_v19, %v211_v10 }
 0x1cf   : > { %v251_v38 = vadd.f32 %v250_v35, %v249_v32 }
 0x1d0   : > { %v229_v22 = vsub.f32 %v219_v20, %v228_v21 }
 0x1d2   : > { %v230_v23 = vsel %vm203_vm0, %v229_v22, 0.0 }
 0x1d3   : > { %v232_v24 = vsel %vm231_vm3, %v230_v23, 0.0 }
 0x1d4   : > { %233 = vadd.xlane.f32.xlu0 %v232_v24 }
 0x261   : > { %v234_v29 = vpop.xlane.xlu0 %233 }
 0x262   : > { %v235_v30 = vrot.slane %v234_v29, 4 }
 0x264   : > { %v236_v31 = vadd.f32 %v235_v30, %v234_v29 }
 0x266   : > { %v237_v33 = vrot.slane %v236_v31, 2 }
 0x268   : > { %v238_v34 = vadd.f32 %v237_v33, %v236_v31 }
 0x26a   : > { %v239_v36 = vrot.slane %v238_v34, 1 }
 0x26c   : > { %v240_v37 = vadd.f32 %v239_v36, %v238_v34 }
 0x26e   : > { %370 = vpush %v240_v37 }
 0x26f   : > { %372 = vpush %v251_v38 }
 0x29f   : > { %s371_s21 = spop %370 }
 0x2a0   : > { %v258_v40 = vstv %s371_s21  ;;  %s373_s25 = spop %372 }
 0x2a1   : > { %v259_v41 = vsel %vm257_vm7, %v258_v40, 0.0  ;;  %v262_v42 = vstv %s373_s25 }
 0x2a2   : > { %v263_v43 = vsel %vm261_vm8, %v262_v42, %v259_v41 }
 0x2a3   : > { %264 = vst [vmem:[%s200_s24] sm:$0xff] %v263_v43 }
 0x2a4 PF: > { %s12_s11 = sadd.s32 1, %s428_s11   ;;  %s497_s9 = smov %s424_s10 }
 0x2a5   : > { %p9_p5 = scmp.ge.s32.totalorder %s12_s11, 4   ;;  %s498_s10 = smov %s500_s12 }
 0x2a7   :  { %11 = sbr.rel (!%p9_p5) target bundleno = 2 (0x2), region = 61 }

</bundles_post_ra>
